<compile_context>
chip_gen: v6e
topology: v6e:2x2x1
jax: 0.10.0
libtpu: 0.0.40
codegen_flags: <defaults>
</compile_context>

<pallas_src>
import functools

import jax
import jax.numpy as jnp
from jax.experimental import pallas as pl
from jax.experimental.pallas import tpu as pltpu


def _round_up(x, m):
    return ((x + m - 1) // m) * m


def _xent_kernel(pred_ref, label_ref, out_ref, *, pad_pos_id, n_tokens,
                 tile_n, blocks_per_slice):
    """Accumulate per-token -log_softmax(pred)[label] for one (C, TILE_N) tile."""
    s = pl.program_id(0)          # slice (megacore-parallel) axis
    i = pl.program_id(1)          # reduction axis over column tiles

    @pl.when(i == 0)
    def _():
        out_ref[...] = jnp.zeros_like(out_ref)

    logits = pred_ref[...].astype(jnp.float32)      # (C, TILE_N): classes on sublanes
    labels = label_ref[...]                         # (1, TILE_N) int32

    # Per-token (per-column) log-softmax over the class (sublane) axis.
    m = jnp.max(logits, axis=0, keepdims=True)                      # (1, TILE_N)
    z = logits - m
    lse = jnp.log(jnp.sum(jnp.exp(z), axis=0, keepdims=True))       # (1, TILE_N)

    # Gather z at the label class via one-hot select + sublane sum (no dyn gather).
    cls = jax.lax.broadcasted_iota(jnp.int32, logits.shape, 0)      # (C, TILE_N)
    z_lab = jnp.sum(jnp.where(cls == labels, z, 0.0), axis=0, keepdims=True)
    neg_logp = lse - z_lab                                          # (1, TILE_N)

    # Validity: not ignore_index AND inside the real token range.  The last
    # tile can read past the end of the array (unspecified values), and a
    # duplicated (index-clamped) tile appears when the block count is odd;
    # both are fully masked here via the global column index.
    block_idx = s * blocks_per_slice + i
    col = jax.lax.broadcasted_iota(jnp.int32, (1, tile_n), 1) + block_idx * tile_n
    valid = (labels != pad_pos_id) & (col < n_tokens)
    # NOTE: labels outside [0, C) that are not pad_pos_id contribute lse (torch
    # would raise); inputs are assumed in-range.

    out_ref[...] += jnp.where(valid, neg_logp, 0.0)


def masked_xent_sum(pred_t, labels_row, pad_pos_id, *, tile_n=16384):
    """Sum over non-ignored tokens of -log_softmax(pred)[:, label].

    pred_t:     (C, N) float logits (classes on the short leading axis).
    labels_row: (1, N) int32 label ids.
    """
    C, N = pred_t.shape
    assert labels_row.shape == (1, N)

    tile = _round_up(min(tile_n, max(N, 128)), 128)
    nblocks = pl.cdiv(N, tile)
    n_slices = 2 if nblocks >= 2 else 1        # leading parallel axis (v7x megacore)
    blocks_per_slice = pl.cdiv(nblocks, n_slices)

    def col_block(s, i):
        # Clamp so the duplicated block of an odd block count stays in bounds;
        # its contribution is masked to zero in-kernel.
        return jnp.minimum(s * blocks_per_slice + i, nblocks - 1)

    kernel = functools.partial(
        _xent_kernel, pad_pos_id=pad_pos_id, n_tokens=N,
        tile_n=tile, blocks_per_slice=blocks_per_slice)

    pred_bytes = pred_t.dtype.itemsize
    cost = pl.CostEstimate(
        flops=10 * N * C,
        transcendentals=N * C + N,
        bytes_accessed=N * C * pred_bytes + N * 4 + n_slices * tile * 4,
    )

    parts = pl.pallas_call(
        kernel,
        out_shape=jax.ShapeDtypeStruct((1, n_slices * tile), jnp.float32),
        grid_spec=pltpu.PrefetchScalarGridSpec(
            num_scalar_prefetch=0,
            grid=(n_slices, blocks_per_slice),
            in_specs=[
                pl.BlockSpec((C, tile), lambda s, i: (0, col_block(s, i))),
                pl.BlockSpec((1, tile), lambda s, i: (0, col_block(s, i))),
            ],
            out_specs=pl.BlockSpec((1, tile), lambda s, i: (0, s)),
        ),
        compiler_params=pltpu.CompilerParams(
            dimension_semantics=("parallel", "arbitrary"),
            vmem_limit_bytes=32 * 1024 * 1024),
        cost_estimate=cost,
    )(pred_t, labels_row)

    # Tiny (n_slices * tile element) final reduction in plain JAX.
    return jnp.sum(parts)


def pos_probe_loss(prediction_batch, label_batch, length_batch, *,
                   num_pos, pad_pos_id, tile_n=16384):
    """JAX/Pallas equivalent of POSProbeLoss.forward.

    prediction_batch: (B, S, C) float "logits" (f32 or bf16; math is f32)
    label_batch:      (B, S)    int POS label ids
    length_batch:     (B,)      int sentence lengths
    Returns (batch_loss: f32 scalar, number_of_sentences: f32 scalar).
    """
    number_of_sentences = jnp.sum(length_batch != 0).astype(jnp.float32)

    pred_flat = prediction_batch.reshape(-1, num_pos)
    label_flat = label_batch.reshape(-1).astype(jnp.int32)
    N = pred_flat.shape[0]

    if N == 0:
        # A zero-sized grid would not compile; torch returns 0.0 here anyway.
        return jnp.float32(0.0), number_of_sentences

    # Lane-dense layout: classes (C ~ 18) on sublanes, tokens on the lane axis.
    # TODO(synk): have the upstream probe emit (C, B*S) directly so this
    # transpose copy fuses away instead of costing one extra HBM pass.
    pred_t = pred_flat.T                      # (C, N)
    labels_row = label_flat.reshape(1, N)     # (1, N), contiguous label DMA

    loss_sum = masked_xent_sum(pred_t, labels_row, pad_pos_id, tile_n=tile_n)
    # Valid-token count in plain JAX: labels are ~1% of the bytes, reduce is free.
    valid_count = jnp.sum(label_flat != pad_pos_id).astype(jnp.float32)

    mean_loss = loss_sum / valid_count  # NaN if every label is ignored (matches torch)
    batch_loss = jnp.where(number_of_sentences > 0, mean_loss, jnp.float32(0.0))
    return batch_loss, number_of_sentences


def _reference_loss(prediction_batch, label_batch, pad_pos_id, num_pos):
    logp = jax.nn.log_softmax(prediction_batch.reshape(-1, num_pos), axis=-1)
    lab = label_batch.reshape(-1)
    valid = lab != pad_pos_id
    picked = jnp.take_along_axis(logp, lab[:, None], axis=-1)[:, 0]
    return jnp.sum(jnp.where(valid, -picked, 0.0)) / jnp.sum(valid)


if __name__ == "__main__":
    NUM_POS = 18                # |pos_set| (e.g. 17 UPOS tags + PAD)
    PAD_POS_ID = 0

    key = jax.random.PRNGKey(0)
    k1, k2, k3, k4 = jax.random.split(key, 4)

    # ---- Test 1: small single-tile batch --------------------------------
    B, S = 2, 8                 # N = 16 token rows
    prediction_batch = jax.random.normal(k1, (B, S, NUM_POS), dtype=jnp.float32)
    lengths = jnp.array([6, 4], dtype=jnp.int32)
    raw_labels = jax.random.randint(k2, (B, S), 1, NUM_POS, dtype=jnp.int32)
    pos_idx = jnp.arange(S)[None, :]
    label_batch = jnp.where(pos_idx < lengths[:, None], raw_labels, PAD_POS_ID)

    loss, n_sent = pos_probe_loss(prediction_batch, label_batch, lengths,
                                  num_pos=NUM_POS, pad_pos_id=PAD_POS_ID)
    loss = jax.block_until_ready(loss)
    n_sent = jax.block_until_ready(n_sent)
    ref_loss = _reference_loss(prediction_batch, label_batch, PAD_POS_ID, NUM_POS)
    assert jnp.allclose(loss, ref_loss, rtol=1e-5, atol=1e-5), (loss, ref_loss)
    assert float(n_sent) == 2.0

    # ---- Test 2: multi-tile, 2 parallel slices, partial tail tile --------
    B2, S2 = 4, 96              # N = 384 -> tile_n=256 gives 2 blocks, 2 slices
    p2 = jax.random.normal(k3, (B2, S2, NUM_POS), dtype=jnp.float32)
    l2_raw = jax.random.randint(k4, (B2, S2), 1, NUM_POS, dtype=jnp.int32)
    len2 = jnp.array([96, 50, 0, 7], dtype=jnp.int32)
    l2 = jnp.where(jnp.arange(S2)[None, :] < len2[:, None], l2_raw, PAD_POS_ID)

    loss2, n2 = pos_probe_loss(p2, l2, len2, num_pos=NUM_POS,
                               pad_pos_id=PAD_POS_ID, tile_n=256)
    loss2 = jax.block_until_ready(loss2)
    ref2 = _reference_loss(p2, l2, PAD_POS_ID, NUM_POS)
    assert jnp.allclose(loss2, ref2, rtol=1e-5, atol=1e-5), (loss2, ref2)
    assert float(n2) == 3.0

    # ---- Test 3: odd block count (duplicated, clamped + masked tile) -----
    loss3, n3 = pos_probe_loss(p2, l2, len2, num_pos=NUM_POS,
                               pad_pos_id=PAD_POS_ID, tile_n=128)  # 3 blocks
    loss3 = jax.block_until_ready(loss3)
    assert jnp.allclose(loss3, ref2, rtol=1e-5, atol=1e-5), (loss3, ref2)
    assert float(n3) == 3.0

    print("KERNEL_OK")
</pallas_src>

<mosaic_0001>
module attributes {stable_mosaic.version = 11 : i64} {
  func.func @_xent_kernel(%arg0: i32, %arg1: i32, %arg2: memref<18x128xf32, #tpu.memory_space<vmem>>, %arg3: memref<1x128xi32, #tpu.memory_space<vmem>>, %arg4: memref<1x128xf32, #tpu.memory_space<vmem>>) attributes {dimension_semantics = [#tpu.dimension_semantics<parallel>, #tpu.dimension_semantics<arbitrary>], iteration_bounds = array<i64: 1, 1>, scalar_prefetch = 0 : i64, scratch_operands = 0 : i64, tpu.core_type = #tpu.core_type<tc>, window_params = [{transform_indices = @transform_0, window_bounds = array<i64: 18, 128>}, {transform_indices = @transform_1, window_bounds = array<i64: 1, 128>}, {transform_indices = @transform_2, window_bounds = array<i64: 1, 128>}]} {
    %c0_i32 = arith.constant 0 : i32
    %0 = arith.cmpi eq, %arg1, %c0_i32 : i32
    %1 = arith.extui %0 : i1 to i32
    %c0_i32_0 = arith.constant 0 : i32
    %2 = arith.cmpi ne, %1, %c0_i32_0 : i32
    scf.if %2 {
      %cst_13 = arith.constant 0.000000e+00 : f32
      %37 = vector.broadcast %cst_13 : f32 to vector<1x128xf32>
      %c0_14 = arith.constant 0 : index
      %c0_15 = arith.constant 0 : index
      %38 = vector.load %arg4[%c0_14, %c0_15] : memref<1x128xf32, #tpu.memory_space<vmem>>, vector<1x128xf32>
      tpu.vector_store %arg4[%c0_14, %c0_15], %37 {strides = array<i32>} : memref<1x128xf32, #tpu.memory_space<vmem>>, vector<1x128xf32>,
    } else {
    }
    %c0 = arith.constant 0 : index
    %c0_1 = arith.constant 0 : index
    %3 = vector.load %arg2[%c0, %c0_1] : memref<18x128xf32, #tpu.memory_space<vmem>>, vector<18x128xf32>
    %c0_2 = arith.constant 0 : index
    %c0_3 = arith.constant 0 : index
    %4 = vector.load %arg3[%c0_2, %c0_3] : memref<1x128xi32, #tpu.memory_space<vmem>>, vector<1x128xi32>
    %cst = arith.constant dense<0xFF800000> : vector<128xf32>
    %5 = vector.multi_reduction <maximumf>, %3, %cst [0] : vector<18x128xf32> to vector<128xf32>
    %6 = vector.shape_cast %5 : vector<128xf32> to vector<1x128xf32>
    %7 = vector.broadcast %6 : vector<1x128xf32> to vector<18x128xf32>
    %8 = arith.subf %3, %7 : vector<18x128xf32>
    %9 = math.exp %8 : vector<18x128xf32>
    %cst_4 = arith.constant dense<0.000000e+00> : vector<128xf32>
    %10 = vector.multi_reduction <add>, %9, %cst_4 [0] : vector<18x128xf32> to vector<128xf32>
    %11 = vector.shape_cast %10 : vector<128xf32> to vector<1x128xf32>
    %12 = math.log %11 : vector<1x128xf32>
    %13 = tpu.iota {dimensions = array<i32: 0>} : vector<18x128xi32>
    %14 = vector.broadcast %4 : vector<1x128xi32> to vector<18x128xi32>
    %15 = arith.cmpi eq, %13, %14 : vector<18x128xi32>
    %cst_5 = arith.constant 0.000000e+00 : f32
    %16 = vector.broadcast %cst_5 : f32 to vector<18x128xf32>
    %17 = arith.select %15, %8, %16 : vector<18x128xi1>, vector<18x128xf32>
    %cst_6 = arith.constant dense<0.000000e+00> : vector<128xf32>
    %18 = vector.multi_reduction <add>, %17, %cst_6 [0] : vector<18x128xf32> to vector<128xf32>
    %19 = vector.shape_cast %18 : vector<128xf32> to vector<1x128xf32>
    %20 = arith.subf %12, %19 : vector<1x128xf32>
    %c1_i32 = arith.constant 1 : i32
    %21 = arith.muli %arg0, %c1_i32 : i32
    %22 = arith.addi %21, %arg1 : i32
    %23 = tpu.iota {dimensions = array<i32: 1>} : vector<1x128xi32>
    %c128_i32 = arith.constant 128 : i32
    %24 = arith.muli %22, %c128_i32 : i32
    %25 = vector.broadcast %24 : i32 to vector<1x128xi32>
    %26 = arith.addi %23, %25 : vector<1x128xi32>
    %c0_i32_7 = arith.constant 0 : i32
    %27 = vector.broadcast %c0_i32_7 : i32 to vector<1x128xi32>
    %28 = arith.cmpi ne, %4, %27 : vector<1x128xi32>
    %c16_i32 = arith.constant 16 : i32
    %29 = vector.broadcast %c16_i32 : i32 to vector<1x128xi32>
    %30 = arith.cmpi slt, %26, %29 : vector<1x128xi32>
    %31 = arith.andi %28, %30 : vector<1x128xi1>
    %c0_8 = arith.constant 0 : index
    %c0_9 = arith.constant 0 : index
    %32 = vector.load %arg4[%c0_8, %c0_9] : memref<1x128xf32, #tpu.memory_space<vmem>>, vector<1x128xf32>
    %cst_10 = arith.constant 0.000000e+00 : f32
    %33 = vector.broadcast %cst_10 : f32 to vector<1x128xf32>
    %34 = arith.select %31, %20, %33 : vector<1x128xi1>, vector<1x128xf32>
    %35 = arith.addf %32, %34 : vector<1x128xf32>
    %c0_11 = arith.constant 0 : index
    %c0_12 = arith.constant 0 : index
    %36 = vector.load %arg4[%c0_11, %c0_12] : memref<1x128xf32, #tpu.memory_space<vmem>>, vector<1x128xf32>
    tpu.vector_store %arg4[%c0_11, %c0_12], %35 {strides = array<i32>} : memref<1x128xf32, #tpu.memory_space<vmem>>, vector<1x128xf32>,
    return
  }
  func.func @transform_0(%arg0: i32, %arg1: i32) -> (i32, i32) {
    %c1_i32 = arith.constant 1 : i32
    %0 = arith.muli %arg0, %c1_i32 : i32
    %1 = arith.addi %0, %arg1 : i32
    %c0_i32 = arith.constant 0 : i32
    %2 = arith.minsi %1, %c0_i32 : i32
    %c0_i32_0 = arith.constant 0 : i32
    %c0_i32_1 = arith.constant 0 : i32
    return %c0_i32_0, %2 : i32, i32
  }
  func.func @transform_1(%arg0: i32, %arg1: i32) -> (i32, i32) {
    %c1_i32 = arith.constant 1 : i32
    %0 = arith.muli %arg0, %c1_i32 : i32
    %1 = arith.addi %0, %arg1 : i32
    %c0_i32 = arith.constant 0 : i32
    %2 = arith.minsi %1, %c0_i32 : i32
    %c0_i32_0 = arith.constant 0 : i32
    %c0_i32_1 = arith.constant 0 : i32
    return %c0_i32_0, %2 : i32, i32
  }
  func.func @transform_2(%arg0: i32, %arg1: i32) -> (i32, i32) {
    %c0_i32 = arith.constant 0 : i32
    %c0_i32_0 = arith.constant 0 : i32
    return %c0_i32, %arg0 : i32, i32
  }
}

</mosaic_0001>

<bundles_post_ra>
// kernel: tpu_custom_call.1
= control target key start
LH: loop header
LB: loop body
LE: loop exit
PB: predicated region body
PF: predicated region fallthrough
CT: control target
= control target key end

     0   :  { %vm72_vm0 = vcmask 1041408   ;;  %v194_v3 = vmov 0.0   ;;  %s229_s0 = inlined_call_operand.vmem [shape: f32[18,16], index: 0, kind: input, shape index: {}]   ;;  %s230_s1 = inlined_call_operand.vmem [shape: s32[1,16], index: 1, kind: input, shape index: {}]   ;;  %s231_s2 = inlined_call_operand.hbm [shape: f32[1,128], index: 2, kind: output, shape index: {}]  }
   0x1   :  { %v68_v0 = vld [vmem:[%s229_s0] sm:$0xff]  ;;  %v69_v1 = vld [vmem:[%s229_s0 + $0x8] sm:$0xff]  ;;  %v70_v2 = vld [vmem:[%s229_s0 + $0x10] sm:$0x3]  ;;  %67 = vst [vmem:[#allocation2] sm:$0x1] %v194_v3 }
   0x2   :  { %v73_v4 = vsel %vm72_vm0, %v70_v2, -inf  ;;  %v74_v5 = vmax.f32 %v68_v0, %v69_v1 }
   0x3   :  { %7 = vsyncpa [#allocation3], 0  ;;  %v102_v12 = vlaneseq  ;;  %v71_v22 = vld [vmem:[%s230_s1] sm:$0x1]  ;;  %s195_s1 = smov [#allocation2]  }
   0x4   :  { %v75_v6 = vmax.f32 %v74_v5, %v73_v4  ;;  %vm132_vm4 = vcmp.ne.s32.totalorder %v71_v22, 0  ;;  %s145_s16 = sshll.u32 %s195_s1, 4  ;;  %s146_s16 = int_to_ptr.vmem [resolvable:$true] %s145_s16 }
   0x5   :  { %v103_v17 = vshrl.u32 %v102_v12, 7  ;;  %v128_v49 = vand.u32 127, %v102_v12  ;;  %s172_s17 = scalar_lea.vmem %s146_s16, 16  ;;  %s176_s18 = scalar_lea.vmem %s146_s16, 32 }
   0x6   :  { %v76_v7 = vrot.slane %v75_v6, 4  ;;  %p173_p0 = scmp.ne.s32.totalorder %s146_s16, %s172_s17  ;;  %p177_p1 = scmp.lt.s32.totalorder %s146_s16, %s146_s16 }
   0x7   :  { %v108_v21 = vsub.s32 0, %v103_v17  ;;  %v104_v23 = vadd.s32 8, %v103_v17  ;;  %v105_v25 = vadd.s32 16, %v103_v17  ;;  %vm133_vm5 = vcmp.lt.s32.totalorder %v128_v49, 16  ;;  %p178_p2 = scmp.lt.s32.totalorder %s176_s18, %s172_s17 }
   0x8   :  { %v77_v8 = vmax.f32 %v75_v6, %v76_v7  ;;  %vm134_vm6 = vmand %vm132_vm4, %vm133_vm5  ;;  %v135_v54 = vld [vmem:[#allocation2] sm:$0x1] }
   0x9   :  { %v109_v24 = vrot.slane %v71_v22, %v108_v21  ;;  %p179_p3 = por %p178_p2, %p177_p1 }
   0xa   :  { %v78_v9 = vrot.slane %v77_v8, 2 }
   0xb   :  { %vm110_vm1 = vcmp.eq.s32.totalorder %v103_v17, %v109_v24  ;;  %vm111_vm2 = vcmp.eq.s32.totalorder %v104_v23, %v109_v24  ;;  %vm112_vm3 = vcmp.eq.s32.totalorder %v105_v25, %v109_v24  ;;  %p180_p4 = pnand %p179_p3, %p173_p0 }
   0xc   :  { %v79_v10 = vmax.f32 %v77_v8, %v78_v9 }
   0xe   :  { %v80_v11 = vrot.slane %v79_v10, 1 }
  0x10   :  { %v81_v13 = vmax.f32 %v79_v10, %v80_v11 }
  0x12   :  { %v82_v14 = vsub.f32 %v68_v0, %v81_v13  ;;  %v83_v15 = vsub.f32 %v69_v1, %v81_v13  ;;  %v84_v16 = vsub.f32 %v70_v2, %v81_v13 }
  0x14   :  { %v85_v18 = vmul.f32 1.442695, %v82_v14  ;;  %v87_v19 = vmul.f32 1.442695, %v83_v15  ;;  %v89_v20 = vmul.f32 1.442695, %v84_v16 }
  0x15   :  { %v113_v26 = vsel %vm110_vm1, %v82_v14, 0.0  ;;  %v114_v27 = vsel %vm111_vm2, %v83_v15, 0.0  ;;  %v115_v29 = vsel %vm112_vm3, %v84_v16, 0.0 }
  0x16   :  { %164 = vpow2.f32 %v85_v18  ;;  %v116_v33 = vadd.f32 %v114_v27, %v113_v26  ;;  %v117_v35 = vsel %vm72_vm0, %v115_v29, 0.0 }
  0x17   :  { %166 = vpow2.f32 %v87_v19 }
  0x18   :  { %168 = vpow2.f32 %v89_v20  ;;  %v118_v38 = vadd.f32 %v117_v35, %v116_v33 }
  0x1a   :  { %v119_v41 = vrot.slane %v118_v38, 4 }
  0x1c   :  { %v120_v44 = vadd.f32 %v119_v41, %v118_v38 }
  0x1e   :  { %v121_v46 = vrot.slane %v120_v44, 2 }
  0x20   :  { %v122_v47 = vadd.f32 %v121_v46, %v120_v44 }
  0x22   :  { %v123_v48 = vrot.slane %v122_v47, 1 }
  0x23   :  { %v165_v28 = vpop.eup %164 }
  0x24   :  { %v167_v30 = vpop.eup %166  ;;  %v124_v50 = vadd.f32 %v123_v48, %v122_v47 }
  0x25   :  { %v169_v31 = vpop.eup %168  ;;  %v91_v32 = vadd.f32 %v167_v30, %v165_v28 }
  0x26   :  { %v92_v34 = vsel %vm72_vm0, %v169_v31, 0.0 }
  0x27   :  { %v93_v36 = vadd.f32 %v92_v34, %v91_v32 }
  0x29   :  { %v94_v37 = vrot.slane %v93_v36, 4 }
  0x2b   :  { %v95_v39 = vadd.f32 %v94_v37, %v93_v36 }
  0x2d   :  { %v96_v40 = vrot.slane %v95_v39, 2 }
  0x2f   :  { %v97_v42 = vadd.f32 %v96_v40, %v95_v39 }
  0x31   :  { %v98_v43 = vrot.slane %v97_v42, 1 }
  0x33   :  { %v99_v45 = vadd.f32 %v98_v43, %v97_v42 }
  0x35   :  { %170 = vlog2.f32 %v99_v45 }
  0x42   :  { %v171_v51 = vpop.eup %170 }
  0x43   :  { %v101_v52 = vmul.f32 0.6931472, %v171_v51 }
  0x45   :  { %v125_v53 = vsub.f32 %v101_v52, %v124_v50 }
  0x47   :  { %v136_v55 = vsel %vm134_vm6, %v125_v53, 0.0 }
  0x48   :  { %v137_v56 = vadd.f32 %v136_v55, %v135_v54 }
  0x4a   :  { %138 = vst [vmem:[#allocation2] sm:$0x1] %v137_v56 }
  0x4b   :  { %183 = shalt.err (!%p180_p4)
}
  0x4c   :  { %148 = dma.vmem_to_hbm [thread:$0]  %s146_s16, 16, %s231_s2, [#allocation3]  }
  0x4d   :  { %192 = dma.done.wait [#allocation3], 16  }
  0x4e   :  { %193 = vsyncadd [#allocation3], 4294967280 }
  0x4f   :  { %152 = vsyncpa [#allocation3], 1 }

</bundles_post_ra>
